<compile_context>
chip_gen: v7x
topology: tpu7x:2x2x1
jax: 0.10.0
libtpu: 0.0.40
codegen_flags: <defaults>
</compile_context>

<pallas_src>
import functools
import time

import jax
import jax.numpy as jnp
from jax.experimental import pallas as pl
from jax.experimental.pallas import tpu as pltpu

latency_attn = []
latency_ffn = []


def _round_up(x, m):
    return ((x + m - 1) // m) * m


def _ffn_kernel(x_ref, wg_ref, wu_ref, wd_ref, o_ref, acc_ref):
    """SwiGLU FFN tile: acc += silu(x@Wg_tile) * (x@Wu_tile) @ Wd_tile."""
    j = pl.program_id(1)

    @pl.when(j == 0)
    def _():
        acc_ref[...] = jnp.zeros_like(acc_ref)

    x = x_ref[...]  # (TM, H) bf16 -> MXU
    g = jnp.dot(x, wg_ref[...], preferred_element_type=jnp.float32)
    u = jnp.dot(x, wu_ref[...], preferred_element_type=jnp.float32)
    # SiLU gate in float32 (v5e has no bf16 VPU/EUP; EUP sigmoid is a free slot).
    h = (g * jax.nn.sigmoid(g)) * u
    acc_ref[...] += jnp.dot(h.astype(wd_ref.dtype), wd_ref[...],
                            preferred_element_type=jnp.float32)

    @pl.when(j == pl.num_programs(1) - 1)
    def _():
        o_ref[...] = acc_ref[...].astype(o_ref.dtype)


@functools.partial(jax.jit, static_argnames=("tm", "ti"))
def _swiglu_ffn(x2, wg, wu, wd, *, tm, ti):
    rows, hidden = x2.shape
    inter = wg.shape[1]

    rows_p = _round_up(rows, tm)
    hp = _round_up(hidden, 128)      # lane-dense output last dim (unmasked vst)
    ip = _round_up(inter, ti)

    # bf16 MXU inputs; zero-padding keeps the math exact (padded cols contribute 0).
    xb = jnp.zeros((rows_p, hp), jnp.bfloat16).at[:rows, :hidden].set(
        x2.astype(jnp.bfloat16))
    wgb = jnp.zeros((hp, ip), jnp.bfloat16).at[:hidden, :inter].set(
        wg.astype(jnp.bfloat16))
    wub = jnp.zeros((hp, ip), jnp.bfloat16).at[:hidden, :inter].set(
        wu.astype(jnp.bfloat16))
    wdb = jnp.zeros((ip, hp), jnp.bfloat16).at[:inter, :hidden].set(
        wd.astype(jnp.bfloat16))

    grid = (rows_p // tm, ip // ti)

    cost = pl.CostEstimate(
        flops=6 * rows_p * hp * ip,
        transcendentals=rows_p * ip,
        bytes_accessed=2 * (rows_p * hp + 3 * hp * ip) + 4 * rows_p * hp,
    )

    # Double-buffered bf16 tiles + resident f32 accumulator, with headroom; clamp
    # so the request stays sane on v7x's 64 MiB VMEM and the toy config alike.
    tile_bytes = 2 * 2 * (tm * hp + 2 * hp * ti + ti * hp + tm * hp) + 4 * tm * hp
    vmem_limit = int(min(100 * 1024 * 1024, max(32 * 1024 * 1024, 2 * tile_bytes)))

    out = pl.pallas_call(
        _ffn_kernel,
        out_shape=jax.ShapeDtypeStruct((rows_p, hp), jnp.float32),
        grid=grid,
        in_specs=[
            pl.BlockSpec((tm, hp), lambda i, j: (i, 0)),   # x rows tile
            pl.BlockSpec((hp, ti), lambda i, j: (0, j)),   # Wg intermediate slice
            pl.BlockSpec((hp, ti), lambda i, j: (0, j)),   # Wu intermediate slice
            pl.BlockSpec((ti, hp), lambda i, j: (j, 0)),   # Wd intermediate slice
        ],
        out_specs=pl.BlockSpec((tm, hp), lambda i, j: (i, 0)),  # constant over j
        scratch_shapes=[pltpu.VMEM((tm, hp), jnp.float32)],
        compiler_params=pltpu.CompilerParams(
            dimension_semantics=("parallel", "arbitrary"),
            vmem_limit_bytes=vmem_limit,
        ),
        cost_estimate=cost,
    )(xb, wgb, wub, wdb)

    return out[:rows, :hidden].astype(x2.dtype)


class LlamaMLP:
    """Wrapped module: Llama-style SwiGLU FFN whose forward runs in the Pallas kernel."""

    def __init__(self, hidden, intermediate, key):
        k1, k2, k3 = jax.random.split(key, 3)
        self.hidden = hidden
        self.intermediate = intermediate
        # Deterministic synthetic weights (no checkpoint load).
        self.wg = jax.random.normal(k1, (hidden, intermediate), jnp.float32) / jnp.sqrt(hidden)
        self.wu = jax.random.normal(k2, (hidden, intermediate), jnp.float32) / jnp.sqrt(hidden)
        self.wd = jax.random.normal(k3, (intermediate, hidden), jnp.float32) / jnp.sqrt(intermediate)

    def __call__(self, x):
        b, s, h = x.shape
        assert h == self.hidden
        rows = b * s
        # Generation-friendly tiles: TM up to 256, TI a 128-multiple up to 512
        # (re-derive TI lower on v7x's 64 MiB VMEM if scaling hidden/intermediate up).
        tm = min(256, _round_up(rows, 8))
        ti = min(512, _round_up(self.intermediate, 128))
        out2 = _swiglu_ffn(x.reshape(rows, h), self.wg, self.wu, self.wd, tm=tm, ti=ti)
        return out2.reshape(b, s, h)


class TimeRecorder:
    """Faithful port of the PyTorch TimeRecorder wrapper (timing is host-side glue)."""

    def __init__(self, module):
        self.module = module

    def __call__(self, *args, **kwargs):
        start_time = time.time()
        output = self.module(*args, **kwargs)
        jax.block_until_ready(output)  # make the wall-clock measurement meaningful on TPU
        end_time = time.time()
        duration = end_time - start_time
        # TODO(synk): class-name dispatch mirrors the PyTorch check; only the FFN
        # branch is exercised here since no LlamaSdpaAttention module is wrapped.
        if self.module.__class__.__name__ == 'LlamaSdpaAttention':
            latency_attn.append(duration)
        else:
            latency_ffn.append(duration)
        return output


if __name__ == "__main__":
    key = jax.random.PRNGKey(0)
    kx, kw = jax.random.split(key)

    batch, seq, hidden, intermediate = 2, 8, 32, 64
    x = jax.random.normal(kx, (batch, seq, hidden), jnp.float32)

    ffn = LlamaMLP(hidden, intermediate, kw)

    # Warm-up / compile outside the timed region so latency_ffn measures the
    # dispatched kernel, not Mosaic compilation.
    warm = ffn(x)
    jax.block_until_ready(warm)

    recorder = TimeRecorder(ffn)
    out = recorder(x)
    jax.block_until_ready(out)

    # Reference check (bf16 MXU inputs -> loose tolerance).
    g = x.reshape(-1, hidden) @ ffn.wg
    u = x.reshape(-1, hidden) @ ffn.wu
    ref = ((g * jax.nn.sigmoid(g)) * u) @ ffn.wd
    ref = ref.reshape(batch, seq, hidden)

    assert out.shape == (batch, seq, hidden)
    assert jnp.all(jnp.isfinite(out))
    assert jnp.allclose(out, ref, rtol=1e-1, atol=1e-1)
    assert len(latency_ffn) == 1 and len(latency_attn) == 0
    print("KERNEL_OK")
</pallas_src>

<mosaic_0001>
module attributes {stable_mosaic.version = 11 : i64} {
  func.func @_ffn_kernel(%arg0: i32, %arg1: i32, %arg2: memref<16x128xbf16, #tpu.memory_space<vmem>>, %arg3: memref<128x128xbf16, #tpu.memory_space<vmem>>, %arg4: memref<128x128xbf16, #tpu.memory_space<vmem>>, %arg5: memref<128x128xbf16, #tpu.memory_space<vmem>>, %arg6: memref<16x128xf32, #tpu.memory_space<vmem>>, %arg7: memref<16x128xf32, #tpu.memory_space<vmem>>) attributes {dimension_semantics = [#tpu.dimension_semantics<parallel>, #tpu.dimension_semantics<arbitrary>], iteration_bounds = array<i64: 1, 1>, scalar_prefetch = 0 : i64, scratch_operands = 1 : i64, tpu.core_type = #tpu.core_type<tc>, window_params = [{transform_indices = @transform_0, window_bounds = array<i64: 16, 128>}, {transform_indices = @transform_1, window_bounds = array<i64: 128, 128>}, {transform_indices = @transform_2, window_bounds = array<i64: 128, 128>}, {transform_indices = @transform_3, window_bounds = array<i64: 128, 128>}, {transform_indices = @transform_4, window_bounds = array<i64: 16, 128>}]} {
    %c0_i32 = arith.constant 0 : i32
    %0 = arith.cmpi eq, %arg1, %c0_i32 : i32
    %1 = arith.extui %0 : i1 to i32
    %c0_i32_0 = arith.constant 0 : i32
    %2 = arith.cmpi ne, %1, %c0_i32_0 : i32
    scf.if %2 {
      %cst_17 = arith.constant 0.000000e+00 : f32
      %24 = vector.broadcast %cst_17 : f32 to vector<16x128xf32>
      %c0_18 = arith.constant 0 : index
      %c0_19 = arith.constant 0 : index
      %25 = vector.load %arg7[%c0_18, %c0_19] : memref<16x128xf32, #tpu.memory_space<vmem>>, vector<16x128xf32>
      tpu.vector_store %arg7[%c0_18, %c0_19], %24 {strides = array<i32>} : memref<16x128xf32, #tpu.memory_space<vmem>>, vector<16x128xf32>,
    } else {
    }
    %c0 = arith.constant 0 : index
    %c0_1 = arith.constant 0 : index
    %3 = vector.load %arg2[%c0, %c0_1] : memref<16x128xbf16, #tpu.memory_space<vmem>>, vector<16x128xbf16>
    %c0_2 = arith.constant 0 : index
    %c0_3 = arith.constant 0 : index
    %4 = vector.load %arg3[%c0_2, %c0_3] : memref<128x128xbf16, #tpu.memory_space<vmem>>, vector<128x128xbf16>
    %cst = arith.constant dense<0.000000e+00> : vector<16x128xf32>
    %5 = tpu.matmul %3, %4, %cst {dimension_numbers = #tpu.dot_dimension_numbers<[1], [0], [0], [1], [0, 0, 1, 1], [], []>} : vector<16x128xbf16>, vector<128x128xbf16>, vector<16x128xf32> -> vector<16x128xf32>
    %c0_4 = arith.constant 0 : index
    %c0_5 = arith.constant 0 : index
    %6 = vector.load %arg4[%c0_4, %c0_5] : memref<128x128xbf16, #tpu.memory_space<vmem>>, vector<128x128xbf16>
    %cst_6 = arith.constant dense<0.000000e+00> : vector<16x128xf32>
    %7 = tpu.matmul %3, %6, %cst_6 {dimension_numbers = #tpu.dot_dimension_numbers<[1], [0], [0], [1], [0, 0, 1, 1], [], []>} : vector<16x128xbf16>, vector<128x128xbf16>, vector<16x128xf32> -> vector<16x128xf32>
    %8 = arith.negf %5 : vector<16x128xf32>
    %9 = math.exp %8 : vector<16x128xf32>
    %cst_7 = arith.constant 1.000000e+00 : f32
    %10 = vector.broadcast %cst_7 : f32 to vector<16x128xf32>
    %11 = arith.addf %10, %9 : vector<16x128xf32>
    %12 = arith.divf %10, %11 : vector<16x128xf32>
    %13 = arith.mulf %5, %12 : vector<16x128xf32>
    %14 = arith.mulf %13, %7 : vector<16x128xf32>
    %c0_8 = arith.constant 0 : index
    %c0_9 = arith.constant 0 : index
    %15 = vector.load %arg7[%c0_8, %c0_9] : memref<16x128xf32, #tpu.memory_space<vmem>>, vector<16x128xf32>
    %16 = arith.truncf %14 : vector<16x128xf32> to vector<16x128xbf16>
    %c0_10 = arith.constant 0 : index
    %c0_11 = arith.constant 0 : index
    %17 = vector.load %arg5[%c0_10, %c0_11] : memref<128x128xbf16, #tpu.memory_space<vmem>>, vector<128x128xbf16>
    %cst_12 = arith.constant dense<0.000000e+00> : vector<16x128xf32>
    %18 = tpu.matmul %16, %17, %cst_12 {dimension_numbers = #tpu.dot_dimension_numbers<[1], [0], [0], [1], [0, 0, 1, 1], [], []>} : vector<16x128xbf16>, vector<128x128xbf16>, vector<16x128xf32> -> vector<16x128xf32>
    %19 = arith.addf %15, %18 : vector<16x128xf32>
    %c0_13 = arith.constant 0 : index
    %c0_14 = arith.constant 0 : index
    %20 = vector.load %arg7[%c0_13, %c0_14] : memref<16x128xf32, #tpu.memory_space<vmem>>, vector<16x128xf32>
    tpu.vector_store %arg7[%c0_13, %c0_14], %19 {strides = array<i32>} : memref<16x128xf32, #tpu.memory_space<vmem>>, vector<16x128xf32>,
    %c0_i32_15 = arith.constant 0 : i32
    %21 = arith.cmpi eq, %arg1, %c0_i32_15 : i32
    %22 = arith.extui %21 : i1 to i32
    %c0_i32_16 = arith.constant 0 : i32
    %23 = arith.cmpi ne, %22, %c0_i32_16 : i32
    scf.if %23 {
      %c0_17 = arith.constant 0 : index
      %c0_18 = arith.constant 0 : index
      %24 = vector.load %arg7[%c0_17, %c0_18] : memref<16x128xf32, #tpu.memory_space<vmem>>, vector<16x128xf32>
      %c0_19 = arith.constant 0 : index
      %c0_20 = arith.constant 0 : index
      %25 = vector.load %arg6[%c0_19, %c0_20] : memref<16x128xf32, #tpu.memory_space<vmem>>, vector<16x128xf32>
      tpu.vector_store %arg6[%c0_19, %c0_20], %24 {strides = array<i32>} : memref<16x128xf32, #tpu.memory_space<vmem>>, vector<16x128xf32>,
    } else {
    }
    return
  }
  func.func @transform_0(%arg0: i32, %arg1: i32) -> (i32, i32) {
    %c0_i32 = arith.constant 0 : i32
    %c0_i32_0 = arith.constant 0 : i32
    return %arg0, %c0_i32 : i32, i32
  }
  func.func @transform_1(%arg0: i32, %arg1: i32) -> (i32, i32) {
    %c0_i32 = arith.constant 0 : i32
    %c0_i32_0 = arith.constant 0 : i32
    return %c0_i32, %arg1 : i32, i32
  }
  func.func @transform_2(%arg0: i32, %arg1: i32) -> (i32, i32) {
    %c0_i32 = arith.constant 0 : i32
    %c0_i32_0 = arith.constant 0 : i32
    return %c0_i32, %arg1 : i32, i32
  }
  func.func @transform_3(%arg0: i32, %arg1: i32) -> (i32, i32) {
    %c0_i32 = arith.constant 0 : i32
    %c0_i32_0 = arith.constant 0 : i32
    return %arg1, %c0_i32 : i32, i32
  }
  func.func @transform_4(%arg0: i32, %arg1: i32) -> (i32, i32) {
    %c0_i32 = arith.constant 0 : i32
    %c0_i32_0 = arith.constant 0 : i32
    return %arg0, %c0_i32 : i32, i32
  }
}

</mosaic_0001>

<bundles_post_ra>
// kernel: _swiglu_ffn.1
= control target key start
LH: loop header
LB: loop body
LE: loop exit
PB: predicated region body
PF: predicated region fallthrough
CT: control target
= control target key end

     0   :  { %v570_v1 = vmov 0.0   ;;  %vm571_vm0 = vmmov 0   ;;  %s717_s0 = inlined_call_operand.vmem [shape: bf16[16,128], index: 0, kind: input, shape index: {}]   ;;  %s718_s1 = inlined_call_operand.vmem [shape: bf16[128,128], index: 1, kind: input, shape index: {}]   ;;  %s719_s2 = inlined_call_operand.vmem [shape: bf16[128,128], index: 2, kind: input, shape index: {}]   ;;  %s720_s3 = inlined_call_operand.vmem [shape: bf16[128,128], index: 3, kind: input, shape index: {}]   ;;  %s721_s4 = inlined_call_operand.hbm [shape: f32[16,128], index: 4, kind: output, shape index: {}]  }
   0x1   :  { %v513_v0 = vld [vmem:[%s718_s1] sm:$0xff]   ;;  %448 = vmatprep.subr.bf16.mxu0 %v570_v1  ;;  %468 = vmatprep.subr.bf16.mxu1 %v570_v1  ;;  %v514_v2 = vld [vmem:[%s718_s1 + $0x8] sm:$0xff]   ;;  %v515_v3 = vld [vmem:[%s718_s1 + $0x10] sm:$0xff]  }
   0x2   :  { %449 = vmatpush3.bf16.msra.mxu0 %v513_v0  ;;  %464 = vmatprep.mubr.msk.bf16.mxu0 %vm571_vm0, %v570_v1  ;;  %v520_v4 = vld [vmem:[%s719_s2] sm:$0xff]   ;;  %v522_v5 = vld [vmem:[%s719_s2 + $0x8] sm:$0xff]   ;;  %v516_v6 = vld [vmem:[%s718_s1 + $0x18] sm:$0xff]  }
   0x3   :  { %450 = vmatprep.subr.bf16.mxu0 %v570_v1  ;;  %484 = vmatprep.mubr.msk.bf16.mxu1 %vm571_vm0, %v570_v1  ;;  %v524_v7 = vld [vmem:[%s719_s2 + $0x10] sm:$0xff]   ;;  %v517_v8 = vld [vmem:[%s718_s1 + $0x20] sm:$0xff]   ;;  %v518_v9 = vld [vmem:[%s718_s1 + $0x28] sm:$0xff]  }
   0x4   :  { %469 = vmatpush3.bf16.msra.mxu1 %v520_v4  ;;  %v525_v10 = vld [vmem:[%s719_s2 + $0x18] sm:$0xff]   ;;  %v526_v11 = vld [vmem:[%s719_s2 + $0x20] sm:$0xff]   ;;  %v519_v12 = vld [vmem:[%s718_s1 + $0x30] sm:$0xff]  }
   0x5   :  { %470 = vmatprep.subr.bf16.mxu1 %v570_v1 }
   0x6   :  { %451 = vmatpush3.bf16.msra.mxu0 %v514_v2 }
   0x7   :  { %452 = vmatprep.subr.bf16.mxu0 %v570_v1 }
   0x8   :  { %471 = vmatpush3.bf16.msra.mxu1 %v522_v5 }
   0x9   :  { %472 = vmatprep.subr.bf16.mxu1 %v570_v1 }
   0xa   :  { %453 = vmatpush3.bf16.msra.mxu0 %v515_v3 }
   0xb   :  { %454 = vmatprep.subr.bf16.mxu0 %v570_v1 }
   0xc   :  { %473 = vmatpush3.bf16.msra.mxu1 %v524_v7 }
   0xd   :  { %474 = vmatprep.subr.bf16.mxu1 %v570_v1 }
   0xe   :  { %455 = vmatpush3.bf16.msra.mxu0 %v516_v6 }
   0xf   :  { %456 = vmatprep.subr.bf16.mxu0 %v570_v1 }
  0x10   :  { %475 = vmatpush3.bf16.msra.mxu1 %v525_v10 }
  0x11   :  { %476 = vmatprep.subr.bf16.mxu1 %v570_v1 }
  0x12   :  { %457 = vmatpush3.bf16.msra.mxu0 %v517_v8 }
  0x13   :  { %458 = vmatprep.subr.bf16.mxu0 %v570_v1 }
  0x16   :  { %459 = vmatpush3.bf16.msra.mxu0 %v518_v9 }
  0x17   :  { %9 = vsyncpa [#allocation4], 0  ;;  %460 = vmatprep.subr.bf16.mxu0 %v570_v1  ;;  %477 = vmatpush3.bf16.msra.mxu1 %v526_v11  ;;  %v527_v13 = vld [vmem:[%s719_s2 + $0x28] sm:$0xff]   ;;  %v521_v14 = vld [vmem:[%s718_s1 + $0x38] sm:$0xff]  }
  0x18   :  { %478 = vmatprep.subr.bf16.mxu1 %v570_v1  ;;  %v523_v15 = vld [vmem:[%s717_s0] sm:$0xff]   ;;  %v528_v16 = vld [vmem:[%s719_s2 + $0x30] sm:$0xff]   ;;  %v529_v17 = vld [vmem:[%s719_s2 + $0x38] sm:$0xff]  }
  0x19   :  { %v530_v18 = vld [vmem:[%s720_s3] sm:$0xff]   ;;  %v531_v19 = vld [vmem:[%s720_s3 + $0x8] sm:$0xff]   ;;  %v532_v20 = vld [vmem:[%s720_s3 + $0x10] sm:$0xff]  }
  0x1a   :  { %461 = vmatpush3.bf16.msra.mxu0 %v519_v12  ;;  %v533_v21 = vld [vmem:[%s720_s3 + $0x18] sm:$0xff]   ;;  %v534_v22 = vld [vmem:[%s720_s3 + $0x20] sm:$0xff]   ;;  %v535_v23 = vld [vmem:[%s720_s3 + $0x28] sm:$0xff]  }
  0x1b   :  { %462 = vmatprep.subr.bf16.mxu0 %v570_v1  ;;  %479 = vmatpush3.bf16.msra.mxu1 %v527_v13  ;;  %v536_v24 = vld [vmem:[%s720_s3 + $0x30] sm:$0xff]   ;;  %v537_v25 = vld [vmem:[%s720_s3 + $0x38] sm:$0xff]   ;;  %s572_s3 = smov [#allocation3]  }
  0x1c   :  { %480 = vmatprep.subr.bf16.mxu1 %v570_v1  ;;  %s383_s10 = sshll.u32 %s572_s3, 4  ;;  %s384_s10 = int_to_ptr.vmem [resolvable:$true] %s383_s10 }
  0x1d   :  { %s546_s11 = scalar_lea.vmem %s384_s10, 256  ;;  %p551_p1 = scmp.lt.s32.totalorder %s384_s10, %s384_s10 }
  0x1e   :  { %463 = vmatpush3.bf16.msra.mxu0 %v521_v14  ;;  %p547_p0 = scmp.ne.s32.totalorder %s384_s10, %s546_s11  ;;  %p552_p2 = scmp.lt.s32.totalorder %s546_s11, %s546_s11 }
  0x1f   :  { %488 = vmatprep.subr.bf16.mxu0 %v570_v1  ;;  %481 = vmatpush3.bf16.msra.mxu1 %v528_v16 }
  0x20   :  { %482 = vmatprep.subr.bf16.mxu1 %v570_v1  ;;  %p553_p3 = por %p552_p2, %p551_p1 }
  0x21   :  { %465 = vmatmul.mubr.bf16.vlgmr.msra.gmra.mrb[0].mxu0 %v523_v15 }
  0x22   :  { %504 = vmatprep.mubr.msk.bf16.mxu0 %vm571_vm0, %v570_v1  ;;  %489 = vmatpush3.bf16.msra.mxu0 %v530_v18  ;;  %p554_p4 = pnand %p553_p3, %p547_p0 }
  0x23   :  { %483 = vmatpush3.bf16.msra.mxu1 %v529_v17  ;;  %490 = vmatprep.subr.bf16.mxu0 %v570_v1 }
  0x26   :  { %485 = vmatmul.mubr.bf16.vlgmr.msra.gmra.mrb[0].mxu1 %v523_v15  ;;  %491 = vmatpush3.bf16.msra.mxu0 %v531_v19 }
  0x27   :  { %492 = vmatprep.subr.bf16.mxu0 %v570_v1 }
  0x2a   :  { %493 = vmatpush3.bf16.msra.mxu0 %v532_v20 }
  0x2b   :  { %494 = vmatprep.subr.bf16.mxu0 %v570_v1 }
  0x2e   :  { %495 = vmatpush3.bf16.msra.mxu0 %v533_v21 }
  0x2f   :  { %496 = vmatprep.subr.bf16.mxu0 %v570_v1 }
  0x32   :  { %497 = vmatpush3.bf16.msra.mxu0 %v534_v22 }
  0x33   :  { %498 = vmatprep.subr.bf16.mxu0 %v570_v1 }
  0x36   :  { %499 = vmatpush3.bf16.msra.mxu0 %v535_v23 }
  0x37   :  { %500 = vmatprep.subr.bf16.mxu0 %v570_v1 }
  0x3a   :  { %501 = vmatpush3.bf16.msra.mxu0 %v536_v24 }
  0x3b   :  { %502 = vmatprep.subr.bf16.mxu0 %v570_v1 }
  0x3e   :  { %503 = vmatpush3.bf16.msra.mxu0 %v537_v25 }
  0xf4   :  { %v131_v26 = vpop.f32.mrb[0].mxu0 }
  0xf5   :  { %v411_v27 = vmul.f32 -1.442695, %v131_v26  ;;  %v466_v28 = vpop.f32.mrb[1].mxu0 }
  0xf6   :  { %v134_v29 = vpop.f32.mrb[2].mxu0 }
  0xf7   :  { %538 = vpow2.f32 %v411_v27  ;;  %v412_v30 = vmul.f32 -1.442695, %v134_v29  ;;  %v467_v31 = vpop.f32.mrb[3].mxu0 }
  0xf9   :  { %540 = vpow2.f32 %v412_v30  ;;  %v236_v32 = vpop.f32.mrb[0].mxu1 }
  0xfa   :  { %v486_v33 = vpop.f32.mrb[1].mxu1 }
  0xfb   :  { %v239_v34 = vpop.f32.mrb[2].mxu1 }
  0xfc   :  { %v487_v35 = vpop.f32.mrb[3].mxu1 }
 0x101   :  { %v539_v36 = vpop.eup %538 }
 0x102   :  { %v249_v37 = vadd.f32 1.0, %v539_v36 }
 0x103   :  { %v541_v38 = vpop.eup %540 }
 0x104   :  { %542 = vrcp.f32 %v249_v37  ;;  %v250_v39 = vadd.f32 1.0, %v541_v38 }
 0x106   :  { %544 = vrcp.f32 %v250_v39 }
 0x10e   :  { %v543_v40 = vpop.eup %542 }
 0x10f   :  { %v255_v41 = vmul.f32 %v543_v40, %v131_v26 }
 0x110   :  { %v545_v42 = vpop.eup %544 }
 0x111   :  { %v256_v43 = vmul.f32 %v545_v42, %v134_v29  ;;  %v257_v44 = vmul.f32 %v255_v41, %v236_v32 }
 0x113   :  { %v258_v45 = vmul.f32 %v256_v43, %v239_v34 }
 0x115   :  { %v261_v46 = vpack.c.bf16 %v258_v45, %v257_v44 }
 0x117   :  { %505 = vmatmul.mubr.bf16.vlgmr.msra.gmra.mrb[4].mxu0 %v261_v46 }
 0x1ea   :  { %v360_v47 = vpop.f32.mrb[4].mxu0 }
 0x1eb   :  { %376 = vst [vmem:[#allocation3] sm:$0xff] %v360_v47  ;;  %v506_v48 = vpop.f32.mrb[5].mxu0 }
 0x1ec   :  { %v363_v49 = vpop.f32.mrb[6].mxu0 }
 0x1ed   :  { %377 = vst [vmem:[#allocation3 + $0x8] sm:$0xff] %v363_v49  ;;  %v507_v50 = vpop.f32.mrb[7].mxu0 }
 0x1ee   :  { %557 = shalt.err (!%p554_p4)
}
 0x1ef   :  { %s558_s14 = scalar_lea.hbm %s721_s4, 256 }
 0x1f0   :  { %p559_p5 = scmp.ne.s32.totalorder %s721_s4, %s558_s14  ;;  %p562_p6 = scmp.lt.u32.totalorder %s558_s14, %s721_s4 }
 0x1f2   :  { %p564_p7 = pnand %p562_p6, %p559_p5 }
 0x1f4   :  { %567 = shalt.err (!%p564_p7)
}
 0x1f5   :  { %s573_s19 = smov 128   ;;  %s574_s20 = smov 8  }
 0x1f6   :  { %389 = dma.vmem_to_hbm [thread:$0]  %s384_s10, 256, %s721_s4, [#allocation4], %s573_s19, %s573_s19, %s574_s20  }
 0x1f7   :  { %568 = dma.done.wait [#allocation4], 256  }
 0x1f8   :  { %569 = vsyncadd [#allocation4], 4294967040 }
 0x1f9   :  { %393 = vsyncpa [#allocation4], 1 }

</bundles_post_ra>
